<compile_context>
chip_gen: v7x
topology: tpu7x:2x2x1
jax: 0.10.0
libtpu: 0.0.40
codegen_flags: <defaults>
</compile_context>

<pallas_src>
import functools

import jax
import jax.numpy as jnp
from jax.experimental import pallas as pl
from jax.experimental.pallas import tpu as pltpu


def _dense_layer_kernel(xpass_ref, xcol_ref, w_ref, b_ref, o_ref, *, cin, cout):
    # xpass_ref: (1, Cin, TL)       f32   original input channels (exact copy)
    # xcol_ref : (1, Kp, TL)        bf16  im2col matrix, Kp = round_up(Cin*k^3, 128)
    # w_ref    : (Cout, Kp)         bf16  conv weights, zero-padded on K
    # b_ref    : (Cout, 1)          f32
    # o_ref    : (1, Cin+Cout, TL)  f32   fused [x, relu(conv(x))] output
    # Passthrough channels (torch.cat([x, ...], dim=1)) -- exact f32 copy.
    o_ref[0, pl.ds(0, cin), :] = xpass_ref[0]
    # Single lane-dense MXU matmul: bf16 inputs, f32 accumulation.
    acc = jnp.dot(w_ref[...], xcol_ref[0], preferred_element_type=jnp.float32)
    acc = acc + b_ref[...]                      # (Cout, 1) broadcast over lanes
    o_ref[0, pl.ds(cin, cout), :] = jnp.maximum(acc, 0.0).astype(o_ref.dtype)


def _pick_spatial_tile(L, cap):
    """Largest multiple-of-128 divisor of L that is <= cap (else L itself)."""
    if L <= cap:
        return L
    t = (cap // 128) * 128
    while t >= 128:
        if L % t == 0:
            return t
        t -= 128
    return L  # fallback: no clean 128-multiple divisor -> single full tile


def dense_layer_forward(x_ncdhw, weight, bias, kernel_size, *, tl_cap=8192):
    """Equivalent of torch.cat([x, relu(conv3d(x))], dim=1), stride 1, 'same' pad.

    x_ncdhw: (N, Cin, D, H, W) float32
    weight : (Cout, Cin, k, k, k)  (PyTorch Conv3d layout)
    bias   : (Cout,)
    """
    N, Cin, D, H, W = x_ncdhw.shape
    Cout = weight.shape[0]
    k = kernel_size
    assert k % 2 == 1, "padding = kernel_size // 2 ('same') requires odd kernel_size"
    p = k // 2
    L = D * H * W
    K = Cin * k * k * k
    Kp = ((K + 127) // 128) * 128           # MXU-native contraction depth
    TL = _pick_spatial_tile(L, tl_cap)      # lane-tile, multiple of 128 (or full L)

    # --- wrapper-side im2col: k^3 static slices of the zero-padded input -----
    x_pad = jnp.pad(x_ncdhw, ((0, 0), (0, 0), (p, p), (p, p), (p, p)))
    patches = [
        x_pad[:, :, kd:kd + D, kh:kh + H, kw:kw + W]
        for kd in range(k) for kh in range(k) for kw in range(k)
    ]
    # (N, Cin, k^3, D, H, W) -> (N, Cin*k^3, L).  Tap order (cin-major, then
    # kd,kh,kw) matches weight.reshape(Cout, Cin*k^3).  Cast to bf16 (under jit
    # the cast fuses into the gather so x_col materializes at half width),
    # then zero-pad the contraction axis to Kp.
    x_col = jnp.stack(patches, axis=2).reshape(N, K, L).astype(jnp.bfloat16)
    x_col = jnp.pad(x_col, ((0, 0), (0, Kp - K), (0, 0)))
    x_flat = x_ncdhw.reshape(N, Cin, L)

    w2d = jnp.pad(weight.reshape(Cout, K).astype(jnp.bfloat16),
                  ((0, 0), (0, Kp - K)))
    b2d = bias.reshape(Cout, 1).astype(jnp.float32)

    kern = functools.partial(_dense_layer_kernel, cin=Cin, cout=Cout)

    # Conservative, generation-safe VMEM request (double-buffered streams).
    tile_bytes = TL * (Kp * 2 + Cin * 4 + (Cin + Cout) * 4) * 2
    vmem_limit = int(max(32 * 1024 * 1024, min(4 * tile_bytes, 64 * 1024 * 1024)))

    out_flat = pl.pallas_call(
        kern,
        out_shape=jax.ShapeDtypeStruct((N, Cin + Cout, L), x_ncdhw.dtype),
        grid_spec=pltpu.PrefetchScalarGridSpec(
            num_scalar_prefetch=0,
            grid=(N, L // TL),
            in_specs=[
                pl.BlockSpec((1, Cin, TL), lambda n, l: (n, 0, l)),
                pl.BlockSpec((1, Kp, TL), lambda n, l: (n, 0, l)),
                pl.BlockSpec((Cout, Kp), lambda n, l: (0, 0)),
                pl.BlockSpec((Cout, 1), lambda n, l: (0, 0)),
            ],
            out_specs=pl.BlockSpec((1, Cin + Cout, TL), lambda n, l: (n, 0, l)),
        ),
        compiler_params=pltpu.CompilerParams(
            dimension_semantics=("parallel", "parallel"),
            vmem_limit_bytes=vmem_limit,
        ),
    )(x_flat, x_col, w2d, b2d)

    # Free (contiguous) reshape back to NCDHW - no transpose / concat needed.
    return out_flat.reshape(N, Cin + Cout, D, H, W)


if __name__ == "__main__":
    key = jax.random.PRNGKey(0)
    kx, kw, kb = jax.random.split(key, 3)

    # small shapes consistent with the module: batch=2, Cin=4, D=H=W=8
    N, Cin, D, H, W = 2, 4, 8, 8, 8
    Cout, ksz = 8, 3

    x = jax.random.normal(kx, (N, Cin, D, H, W), jnp.float32)

    # deterministic Conv3d-style init (uniform +-1/sqrt(fan_in))
    fan_in = Cin * ksz ** 3
    bound = 1.0 / (fan_in ** 0.5)
    weight = jax.random.uniform(kw, (Cout, Cin, ksz, ksz, ksz), jnp.float32,
                                -bound, bound)
    bias = jax.random.uniform(kb, (Cout,), jnp.float32, -bound, bound)

    fwd = jax.jit(dense_layer_forward, static_argnums=(3,))
    out = fwd(x, weight, bias, ksz)
    out = jax.block_until_ready(out)

    # References: bf16-input conv (the kernel's compute precision, f32 accum)
    # for a tight check, and exact-f32 conv (module semantics) as a sanity check.
    dn = ("NCDHW", "OIDHW", "NCDHW")
    conv_bf16 = jax.lax.conv_general_dilated(
        x.astype(jnp.bfloat16), weight.astype(jnp.bfloat16),
        window_strides=(1, 1, 1), padding=[(1, 1)] * 3, dimension_numbers=dn,
        preferred_element_type=jnp.float32)
    conv_f32 = jax.lax.conv_general_dilated(
        x, weight, window_strides=(1, 1, 1), padding=[(1, 1)] * 3,
        dimension_numbers=dn)
    bias_b = bias[None, :, None, None, None]
    ref_bf16 = jnp.concatenate([x, jnp.maximum(conv_bf16 + bias_b, 0.0)], axis=1)
    ref_f32 = jnp.concatenate([x, jnp.maximum(conv_f32 + bias_b, 0.0)], axis=1)

    assert out.shape == (N, Cin + Cout, D, H, W), out.shape
    assert out.dtype == jnp.float32
    assert jnp.allclose(out, ref_bf16, atol=2e-3, rtol=2e-3), float(
        jnp.max(jnp.abs(out - ref_bf16)))
    assert jnp.allclose(out, ref_f32, atol=1e-1, rtol=1e-1), float(
        jnp.max(jnp.abs(out - ref_f32)))
    print("KERNEL_OK")
</pallas_src>

<mosaic_0001>
module attributes {stable_mosaic.version = 11 : i64} {
  func.func @_dense_layer_kernel(%arg0: i32, %arg1: i32, %arg2: memref<1x4x512xf32, #tpu.memory_space<vmem>>, %arg3: memref<1x128x512xbf16, #tpu.memory_space<vmem>>, %arg4: memref<8x128xbf16, #tpu.memory_space<vmem>>, %arg5: memref<8x1xf32, #tpu.memory_space<vmem>>, %arg6: memref<1x12x512xf32, #tpu.memory_space<vmem>>) attributes {dimension_semantics = [#tpu.dimension_semantics<parallel>, #tpu.dimension_semantics<parallel>], iteration_bounds = array<i64: 2, 1>, scalar_prefetch = 0 : i64, scratch_operands = 0 : i64, tpu.core_type = #tpu.core_type<tc>, window_params = [{transform_indices = @transform_0, window_bounds = array<i64: 1, 4, 512>}, {transform_indices = @transform_1, window_bounds = array<i64: 1, 128, 512>}, {pipeline_mode = #tpu.pipeline_mode<synchronous>, transform_indices = @transform_2, window_bounds = array<i64: 8, 128>}, {pipeline_mode = #tpu.pipeline_mode<synchronous>, transform_indices = @transform_3, window_bounds = array<i64: 8, 1>}, {transform_indices = @transform_4, window_bounds = array<i64: 1, 12, 512>}]} {
    %c0 = arith.constant 0 : index
    %c0_0 = arith.constant 0 : index
    %c0_1 = arith.constant 0 : index
    %0 = vector.load %arg2[%c0, %c0_0, %c0_1] : memref<1x4x512xf32, #tpu.memory_space<vmem>>, vector<1x4x512xf32>
    %1 = vector.shape_cast %0 : vector<1x4x512xf32> to vector<4x512xf32>
    %c0_2 = arith.constant 0 : index
    %c0_3 = arith.constant 0 : index
    %c0_4 = arith.constant 0 : index
    %2 = vector.load %arg6[%c0_2, %c0_3, %c0_4] : memref<1x12x512xf32, #tpu.memory_space<vmem>>, vector<1x4x512xf32>
    %3 = vector.shape_cast %2 : vector<1x4x512xf32> to vector<4x512xf32>
    %4 = vector.shape_cast %1 : vector<4x512xf32> to vector<1x4x512xf32>
    tpu.vector_store %arg6[%c0_2, %c0_3, %c0_4], %4 {strides = array<i32>} : memref<1x12x512xf32, #tpu.memory_space<vmem>>, vector<1x4x512xf32>,
    %c0_5 = arith.constant 0 : index
    %c0_6 = arith.constant 0 : index
    %5 = vector.load %arg4[%c0_5, %c0_6] : memref<8x128xbf16, #tpu.memory_space<vmem>>, vector<8x128xbf16>
    %c0_7 = arith.constant 0 : index
    %c0_8 = arith.constant 0 : index
    %c0_9 = arith.constant 0 : index
    %6 = vector.load %arg3[%c0_7, %c0_8, %c0_9] : memref<1x128x512xbf16, #tpu.memory_space<vmem>>, vector<1x128x512xbf16>
    %7 = vector.shape_cast %6 : vector<1x128x512xbf16> to vector<128x512xbf16>
    %cst = arith.constant dense<0.000000e+00> : vector<8x512xf32>
    %8 = tpu.matmul %5, %7, %cst {dimension_numbers = #tpu.dot_dimension_numbers<[1], [0], [0], [1], [0, 0, 1, 1], [], []>} : vector<8x128xbf16>, vector<128x512xbf16>, vector<8x512xf32> -> vector<8x512xf32>
    %c0_10 = arith.constant 0 : index
    %c0_11 = arith.constant 0 : index
    %9 = vector.load %arg5[%c0_10, %c0_11] : memref<8x1xf32, #tpu.memory_space<vmem>>, vector<8x1xf32>
    %10 = vector.broadcast %9 : vector<8x1xf32> to vector<8x512xf32>
    %11 = arith.addf %8, %10 : vector<8x512xf32>
    %cst_12 = arith.constant 0.000000e+00 : f32
    %12 = vector.broadcast %cst_12 : f32 to vector<8x512xf32>
    %13 = arith.maximumf %11, %12 : vector<8x512xf32>
    %c0_13 = arith.constant 0 : index
    %c4 = arith.constant 4 : index
    %c0_14 = arith.constant 0 : index
    %14 = vector.load %arg6[%c0_13, %c4, %c0_14] : memref<1x12x512xf32, #tpu.memory_space<vmem>>, vector<1x8x512xf32>
    %15 = vector.shape_cast %14 : vector<1x8x512xf32> to vector<8x512xf32>
    %16 = vector.shape_cast %13 : vector<8x512xf32> to vector<1x8x512xf32>
    tpu.vector_store %arg6[%c0_13, %c4, %c0_14], %16 {strides = array<i32>} : memref<1x12x512xf32, #tpu.memory_space<vmem>>, vector<1x8x512xf32>,
    return
  }
  func.func @transform_0(%arg0: i32, %arg1: i32) -> (i32, i32, i32) {
    %c0_i32 = arith.constant 0 : i32
    %c0_i32_0 = arith.constant 0 : i32
    return %arg0, %c0_i32, %arg1 : i32, i32, i32
  }
  func.func @transform_1(%arg0: i32, %arg1: i32) -> (i32, i32, i32) {
    %c0_i32 = arith.constant 0 : i32
    %c0_i32_0 = arith.constant 0 : i32
    return %arg0, %c0_i32, %arg1 : i32, i32, i32
  }
  func.func @transform_2(%arg0: i32, %arg1: i32) -> (i32, i32) {
    %c0_i32 = arith.constant 0 : i32
    %c0_i32_0 = arith.constant 0 : i32
    %c0_i32_1 = arith.constant 0 : i32
    return %c0_i32, %c0_i32_0 : i32, i32
  }
  func.func @transform_3(%arg0: i32, %arg1: i32) -> (i32, i32) {
    %c0_i32 = arith.constant 0 : i32
    %c0_i32_0 = arith.constant 0 : i32
    %c0_i32_1 = arith.constant 0 : i32
    return %c0_i32, %c0_i32_0 : i32, i32
  }
  func.func @transform_4(%arg0: i32, %arg1: i32) -> (i32, i32, i32) {
    %c0_i32 = arith.constant 0 : i32
    %c0_i32_0 = arith.constant 0 : i32
    return %arg0, %c0_i32, %arg1 : i32, i32, i32
  }
}

</mosaic_0001>

<bundles_post_ra>
// kernel: dense_layer_forward.1
= control target key start
LH: loop header
LB: loop body
LE: loop exit
PB: predicated region body
PF: predicated region fallthrough
CT: control target
= control target key end

     0   :  { %s870_s15 = smov 0   ;;  %s872_s16 = smov 0   ;;  %s961_s0 = inlined_call_operand.vmem [shape: f32[2,4,512], index: 0, kind: input, shape index: {}]   ;;  %s962_s1 = inlined_call_operand.vmem [shape: bf16[2,128,512], index: 1, kind: input, shape index: {}]   ;;  %s963_s2 = inlined_call_operand.vmem [shape: bf16[8,128], index: 2, kind: input, shape index: {}]   ;;  %s964_s3 = inlined_call_operand.vmem [shape: f32[8,1], index: 3, kind: input, shape index: {}]   ;;  %s965_s4 = inlined_call_operand.vmem [shape: f32[2,12,512], index: 4, kind: output, shape index: {}]  }
   0x1   :  { %s874_s17 = smov 0  }
   0x2 LB: > { %s26_s18 = sadd.s32 1, %s838_s16  ;;  %p700_p0 = scmp.ge.s32.totalorder %s842_s17, 1  ;;  %s842_s17 = sphi %s874_s17, %s14_s17   ;;  %s838_s16 = sphi %s872_s16, %s967_s16   ;;  %s834_s15 = sphi %s870_s15, %s966_s15  }
   0x3   : > { %p28_p1 = scmp.ge.s32.totalorder %s26_s18, 2  ;;  %p200_p2 = scmp.lt.s32.totalorder %s842_s17, 3 }
   0x5   : > { %s969_s18 = smov (%p28_p1, %s26_s18), 0  ;;  %p201_p3 = pnand %p700_p0, %p200_p2 }
   0x6   : > { %p244_p4 = scmp.lt.s32.totalorder (!%p201_p3), %s834_s15, 1  ;;  %v319_v0 = vld [vmem:[%s964_s3] sm:$0xff] (!%p201_p3)  ;;  %v844_v1 = vmov (!%p201_p3), 0  }
   0x7   : > { %204 = sbr.rel (%p201_p3) target bundleno = 270 (0x10e), region = 36  ;;  %517 = vmatprep.mubr.bf16.mxu0 (!%p201_p3), %v844_v1  ;;  %558 = vmatprep.mubr.bf16.mxu1 (!%p201_p3), %v844_v1  ;;  %v286_v38 = vld [vmem:[%s963_s2] sm:$0xf] (!%p201_p3) }
   0x8   : > { %769 = vset.pattern.permute.xlu0 (!%p201_p3), %v844_v1 }
   0x9   : > { %322 = vperm.xlu0 (!%p201_p3), %769, %v319_v0  }
   0xe   : > { %s971_s15 = smov (!%p244_p4, %s834_s15), 1 }
   0xf   : > { %s742_s21 = sshll.u32 %s971_s15, 8  ;;  %s741_s25 = sshll.u32 %s971_s15, 4 }
  0x10   : > { %s897_s24 = scalar_lea.vmem %s962_s1, %s742_s21  ;;  %s743_s26 = sshll.u32 %s971_s15, 6 }
  0x11   : > { %v770_v2 = vld [vmem:[%s897_s24 + $0x4] ss:$16 sps:$4 sm:$0xff]   ;;  %v772_v3 = vld [vmem:[%s897_s24 + $0xc] ss:$16 sps:$4 sm:$0xff]   ;;  %v774_v4 = vld [vmem:[%s897_s24] ss:$16 sps:$4 sm:$0xff]   ;;  %s251_s29 = scalar_lea.vmem %s961_s0, %s741_s25  ;;  %s930_s6 = scalar_lea.vmem %s965_s4, %s743_s26 }
  0x12   : > { %485 = vmatprep.subr.bf16.mxu0 %v770_v2  ;;  %v775_v5 = vld [vmem:[%s897_s24 + $0x8] ss:$16 sps:$4 sm:$0xff]   ;;  %526 = vmatprep.subr.bf16.mxu1 %v772_v3  ;;  %v776_v6 = vld [vmem:[%s897_s24 + $0x24] ss:$16 sps:$4 sm:$0xff]   ;;  %v778_v7 = vld [vmem:[%s897_s24 + $0x2c] ss:$16 sps:$4 sm:$0xff]  }
  0x13   : > { %486 = vmatpush1.bf16.msra.mxu0 %v774_v4  ;;  %527 = vmatpush1.bf16.msra.mxu1 %v775_v5  ;;  %v780_v8 = vld [vmem:[%s897_s24 + $0x20] ss:$16 sps:$4 sm:$0xff]   ;;  %v781_v9 = vld [vmem:[%s897_s24 + $0x28] ss:$16 sps:$4 sm:$0xff]   ;;  %v782_v10 = vld [vmem:[%s897_s24 + $0x44] ss:$16 sps:$4 sm:$0xff]  }
  0x14   : > { %487 = vmatprep.subr.bf16.mxu0 %v776_v6  ;;  %528 = vmatprep.subr.bf16.mxu1 %v778_v7  ;;  %v784_v11 = vld [vmem:[%s897_s24 + $0x4c] ss:$16 sps:$4 sm:$0xff]   ;;  %v786_v12 = vld [vmem:[%s897_s24 + $0x40] ss:$16 sps:$4 sm:$0xff]   ;;  %v787_v13 = vld [vmem:[%s897_s24 + $0x48] ss:$16 sps:$4 sm:$0xff]  }
  0x15   : > { %v788_v14 = vld [vmem:[%s897_s24 + $0x64] ss:$16 sps:$4 sm:$0xff]   ;;  %v790_v15 = vld [vmem:[%s897_s24 + $0x6c] ss:$16 sps:$4 sm:$0xff]   ;;  %v792_v16 = vld [vmem:[%s897_s24 + $0x60] ss:$16 sps:$4 sm:$0xff]  }
  0x16   : > { %v793_v17 = vld [vmem:[%s897_s24 + $0x68] ss:$16 sps:$4 sm:$0xff]   ;;  %v794_v18 = vld [vmem:[%s897_s24 + $0x84] ss:$16 sps:$4 sm:$0xff]   ;;  %v796_v19 = vld [vmem:[%s897_s24 + $0x8c] ss:$16 sps:$4 sm:$0xff]  }
  0x17   : > { %488 = vmatpush1.bf16.msra.mxu0 %v780_v8  ;;  %529 = vmatpush1.bf16.msra.mxu1 %v781_v9  ;;  %v798_v20 = vld [vmem:[%s897_s24 + $0x80] ss:$16 sps:$4 sm:$0xff]   ;;  %v799_v21 = vld [vmem:[%s897_s24 + $0x88] ss:$16 sps:$4 sm:$0xff]   ;;  %v800_v22 = vld [vmem:[%s897_s24 + $0xa4] ss:$16 sps:$4 sm:$0xff]  }
  0x18   : > { %489 = vmatprep.subr.bf16.mxu0 %v782_v10  ;;  %530 = vmatprep.subr.bf16.mxu1 %v784_v11  ;;  %v802_v23 = vld [vmem:[%s897_s24 + $0xac] ss:$16 sps:$4 sm:$0xff]   ;;  %v804_v24 = vld [vmem:[%s897_s24 + $0xa0] ss:$16 sps:$4 sm:$0xff]   ;;  %v805_v25 = vld [vmem:[%s897_s24 + $0xa8] ss:$16 sps:$4 sm:$0xff]  }
  0x19   : > { %v806_v26 = vld [vmem:[%s897_s24 + $0xc4] ss:$16 sps:$4 sm:$0xff]   ;;  %v808_v27 = vld [vmem:[%s897_s24 + $0xcc] ss:$16 sps:$4 sm:$0xff]   ;;  %v810_v32 = vld [vmem:[%s897_s24 + $0xc0] ss:$16 sps:$4 sm:$0xff]  }
  0x1a   : > { %v274_v28 = vld [vmem:[%s251_s29] sm:$0xff]  ;;  %v275_v29 = vld [vmem:[%s251_s29 + $0x8] sm:$0xff] }
  0x1b   : > { %490 = vmatpush1.bf16.msra.mxu0 %v786_v12  ;;  %531 = vmatpush1.bf16.msra.mxu1 %v787_v13  ;;  %v278_v30 = vcombine.high %v274_v28, %v274_v28  ;;  %v279_v31 = vcombine.high %v275_v29, %v275_v29  ;;  %282 = vst [vmem:[%s930_s6] sm:$0xf] %v274_v28  ;;  %284 = vst [vmem:[%s930_s6 + $0x10] sm:$0xf] %v275_v29  ;;  %v811_v33 = vld [vmem:[%s897_s24 + $0xc8] ss:$16 sps:$4 sm:$0xff]  }
  0x1c   : > { %491 = vmatprep.subr.bf16.mxu0 %v788_v14  ;;  %532 = vmatprep.subr.bf16.mxu1 %v790_v15  ;;  %v812_v34 = vld [vmem:[%s897_s24 + $0xe4] ss:$16 sps:$4 sm:$0xff]   ;;  %v814_v35 = vld [vmem:[%s897_s24 + $0xec] ss:$16 sps:$4 sm:$0xff]   ;;  %v816_v36 = vld [vmem:[%s897_s24 + $0xe0] ss:$16 sps:$4 sm:$0xff]  }
  0x1d   : > { %283 = vst [vmem:[%s930_s6 + $0x8] sm:$0xf] %v278_v30  ;;  %285 = vst [vmem:[%s930_s6 + $0x18] sm:$0xf] %v279_v31  ;;  %v817_v37 = vld [vmem:[%s897_s24 + $0xe8] ss:$16 sps:$4 sm:$0xff]  }
  0x1f   : > { %492 = vmatpush1.bf16.msra.mxu0 %v792_v16  ;;  %533 = vmatpush1.bf16.msra.mxu1 %v793_v17 }
  0x20   : > { %493 = vmatprep.subr.bf16.mxu0 %v794_v18  ;;  %534 = vmatprep.subr.bf16.mxu1 %v796_v19 }
  0x23   : > { %494 = vmatpush1.bf16.msra.mxu0 %v798_v20  ;;  %535 = vmatpush1.bf16.msra.mxu1 %v799_v21 }
  0x24   : > { %495 = vmatprep.subr.bf16.mxu0 %v800_v22  ;;  %536 = vmatprep.subr.bf16.mxu1 %v802_v23 }
  0x27   : > { %496 = vmatpush1.bf16.msra.mxu0 %v804_v24  ;;  %537 = vmatpush1.bf16.msra.mxu1 %v805_v25 }
  0x28   : > { %497 = vmatprep.subr.bf16.mxu0 %v806_v26  ;;  %538 = vmatprep.subr.bf16.mxu1 %v808_v27 }
  0x2b   : > { %498 = vmatpush1.bf16.msra.mxu0 %v810_v32  ;;  %539 = vmatpush1.bf16.msra.mxu1 %v811_v33 }
  0x2c   : > { %499 = vmatprep.subr.bf16.mxu0 %v812_v34  ;;  %540 = vmatprep.subr.bf16.mxu1 %v814_v35 }
  0x2f   : > { %500 = vmatpush1.bf16.msra.mxu0 %v816_v36  ;;  %541 = vmatpush1.bf16.msra.mxu1 %v817_v37 }
  0x32   : > { %518 = vmatmul.mubr.bf16.vlgmr.msra.gmra.mrb[0].mxu0 %v286_v38  ;;  %559 = vmatmul.mubr.bf16.vlgmr.msra.gmra.mrb[0].mxu1 %v286_v38 }
  0x88   : > { %v323_v39 = vpop.permute.xlu0 %322 }
 0x105   : > { %v519_v40 = vpop.f32.mrb[0].mxu0  ;;  %v560_v41 = vpop.f32.mrb[0].mxu1 }
 0x106   : > { %v520_v42 = vadd.f32 %v519_v40, %v323_v39  ;;  %v561_v43 = vadd.f32 %v560_v41, %v323_v39  ;;  %v521_v44 = vpop.f32.mrb[1].mxu0  ;;  %v562_v45 = vpop.f32.mrb[1].mxu1 }
 0x107   : > { %v522_v46 = vadd.f32 %v521_v44, %v323_v39  ;;  %v563_v47 = vadd.f32 %v562_v45, %v323_v39  ;;  %v523_v48 = vpop.f32.mrb[2].mxu0  ;;  %v564_v49 = vpop.f32.mrb[2].mxu1 }
 0x108   : > { %v567_v50 = vmax.f32 %v520_v42, 0.0  ;;  %v569_v51 = vmax.f32 %v561_v43, 0.0  ;;  %v524_v52 = vpop.f32.mrb[3].mxu0  ;;  %v565_v53 = vpop.f32.mrb[3].mxu1 }
 0x109   : > { %v568_v54 = vmax.f32 %v522_v46, 0.0  ;;  %v570_v55 = vmax.f32 %v563_v47, 0.0 }
 0x10a   : > { %v575_v56 = vrot.slane %v567_v50, 4  ;;  %v577_v57 = vrot.slane %v569_v51, 4 }
 0x10b   : > { %v576_v58 = vrot.slane %v568_v54, 4  ;;  %v578_v59 = vrot.slane %v570_v55, 4 }
 0x10c   : > { %583 = vst [vmem:[%s930_s6 + $0x20] ss:$-28 sps:$4 sm:$0xff] %v575_v56   ;;  %585 = vst [vmem:[%s930_s6 + $0x30] ss:$-28 sps:$4 sm:$0xff] %v577_v57  }
 0x10d   : > { %584 = vst [vmem:[%s930_s6 + $0x28] ss:$-28 sps:$4 sm:$0xff] %v576_v58   ;;  %586 = vst [vmem:[%s930_s6 + $0x38] ss:$-28 sps:$4 sm:$0xff] %v578_v59  }
 0x10e PF: > { %s14_s17 = sadd.s32 1, %s842_s17   ;;  %s966_s15 = smov %s838_s16 }
 0x10f   : > { %p11_p5 = scmp.ge.s32.totalorder %s14_s17, 4   ;;  %s967_s16 = smov %s969_s18 }
 0x111   :  { %13 = sbr.rel (!%p11_p5) target bundleno = 2 (0x2), region = 69 }

</bundles_post_ra>
